<compile_context>
chip_gen: v6e
topology: v6e:2x2x1
jax: 0.10.0
libtpu: 0.0.40
codegen_flags: <defaults>
</compile_context>

<pallas_src>
import jax
import jax.numpy as jnp
from jax.experimental import pallas as pl
from jax.experimental.pallas import tpu as pltpu

# Packed small-parameter layout (all segment starts are multiples of 128 lanes).
_B1_OFF, _B1_LEN = 0, 256
_B2_OFF, _B2_LEN = 256, 128
_B3_OFF, _B3_LEN = 384, 64
_W4_OFF, _W4_LEN = 512, 64
_B4_OFF, _B4_LEN = 640, 1
_PACK_LEN = 768  # 6 * 128


def mlp_kernel(x_ref, w1_ref, w2_ref, w3_ref, p_ref, o_ref):
    # Static slices of the packed (1, 768) small-parameter row (zero-cost views).
    b1 = p_ref[:, _B1_OFF:_B1_OFF + _B1_LEN]          # (1, 256) f32
    b2 = p_ref[:, _B2_OFF:_B2_OFF + _B2_LEN]          # (1, 128) f32
    b3 = p_ref[:, _B3_OFF:_B3_OFF + _B3_LEN]          # (1, 64)  f32
    w4 = p_ref[:, _W4_OFF:_W4_OFF + _W4_LEN]          # (1, 64)  f32
    b4 = p_ref[:, _B4_OFF:_B4_OFF + _B4_LEN]          # (1, 1)   f32

    # fc1 + ReLU  (bf16 x bf16 -> f32 accumulate on the MXU, K=600 tail masked)
    h = jnp.dot(x_ref[...].astype(jnp.bfloat16), w1_ref[...],
                preferred_element_type=jnp.float32)
    h = jnp.maximum(h + b1, 0.0)
    # fc2 + ReLU
    h = jnp.dot(h.astype(jnp.bfloat16), w2_ref[...],
                preferred_element_type=jnp.float32)
    h = jnp.maximum(h + b2, 0.0)
    # fc3 + ReLU
    h = jnp.dot(h.astype(jnp.bfloat16), w3_ref[...],
                preferred_element_type=jnp.float32)
    h = jnp.maximum(h + b3, 0.0)
    # fc4 (N=1): VPU multiply + XLU lane reduction instead of a degenerate matmul.
    out = jnp.sum(h * w4, axis=-1, keepdims=True) + b4
    o_ref[...] = out.astype(o_ref.dtype)


def simple_overfitting_forward(x, kparams):
    """x: (B, 600) f32.  kparams: output of prepare_params."""
    B, F = x.shape
    w1, w2, w3, packed = kparams
    assert w1.shape[0] == F

    # Batch tile: whole batch if small (block dim == full dim is always legal),
    # otherwise 256-row tiles (divisible by 8; edge tile masked by Mosaic).
    TB = B if B <= 256 else 256
    grid = (pl.cdiv(B, TB),)

    in_specs = [
        pl.BlockSpec((TB, F), lambda i: (i, 0)),          # x: tiled over batch
        pl.BlockSpec(w1.shape, lambda i: (0, 0)),         # weights: constant ->
        pl.BlockSpec(w2.shape, lambda i: (0, 0)),         #   DMA'd once, reused
        pl.BlockSpec(w3.shape, lambda i: (0, 0)),
        pl.BlockSpec(packed.shape, lambda i: (0, 0)),     # packed b1,b2,b3,w4,b4
    ]
    out_specs = pl.BlockSpec((TB, 1), lambda i: (i, 0))

    return pl.pallas_call(
        mlp_kernel,
        out_shape=jax.ShapeDtypeStruct((B, 1), jnp.float32),
        grid=grid,
        in_specs=in_specs,
        out_specs=out_specs,
        compiler_params=pltpu.CompilerParams(
            dimension_semantics=("parallel",),   # shards batch tiles on v7x's 2 TCs
            vmem_limit_bytes=8 << 20,
        ),
    )(x, w1, w2, w3, packed)


# --------------------------- parameter handling ---------------------------

def xavier_normal(key, fan_in, fan_out):
    # Matches torch.nn.init.xavier_normal_: std = sqrt(2 / (fan_in + fan_out)).
    std = (2.0 / (fan_in + fan_out)) ** 0.5
    return std * jax.random.normal(key, (fan_in, fan_out), dtype=jnp.float32)


def init_params(key, input_size=600):
    """f32 reference params, same init as the PyTorch module (bias = 0).
    Weights stored transposed vs PyTorch: (in, out)."""
    dims = [(input_size, 256), (256, 128), (128, 64), (64, 1)]
    keys = jax.random.split(key, len(dims))
    params = []
    for k, (fi, fo) in zip(keys, dims):
        w = xavier_normal(k, fi, fo)
        b = jnp.zeros((fo,), dtype=jnp.float32)
        params.append((w, b))
    return params


def prepare_params(params_f32):
    """Kernel layout: W1..W3 as bf16 (in, out); b1, b2, b3, w4-row, b4 packed
    into a single (1, 768) f32 row with 128-aligned segment starts."""
    (w1, b1), (w2, b2), (w3, b3), (w4, b4) = params_f32
    packed = jnp.zeros((1, _PACK_LEN), dtype=jnp.float32)
    packed = packed.at[0, _B1_OFF:_B1_OFF + _B1_LEN].set(b1)
    packed = packed.at[0, _B2_OFF:_B2_OFF + _B2_LEN].set(b2)
    packed = packed.at[0, _B3_OFF:_B3_OFF + _B3_LEN].set(b3)
    packed = packed.at[0, _W4_OFF:_W4_OFF + _W4_LEN].set(w4.reshape(-1))  # (64,1)->64
    packed = packed.at[0, _B4_OFF:_B4_OFF + _B4_LEN].set(b4)
    return (w1.astype(jnp.bfloat16),
            w2.astype(jnp.bfloat16),
            w3.astype(jnp.bfloat16),
            packed)


# --------------------------------- main -----------------------------------

if __name__ == "__main__":
    key = jax.random.PRNGKey(0)
    k_params, k_x = jax.random.split(key)

    INPUT_SIZE = 600
    BATCH = 8

    params_f32 = init_params(k_params, INPUT_SIZE)
    kparams = prepare_params(params_f32)
    x = jax.random.normal(k_x, (BATCH, INPUT_SIZE), dtype=jnp.float32)

    out = simple_overfitting_forward(x, kparams)
    out = jax.block_until_ready(out)
    assert out.shape == (BATCH, 1)

    # Reference 1: mirrors the kernel's precision choices (bf16 weights/operands,
    # f32 accumulation) -> tight tolerance.
    h = x
    for w, b in params_f32[:3]:
        h = jnp.dot(h.astype(jnp.bfloat16), w.astype(jnp.bfloat16),
                    preferred_element_type=jnp.float32) + b
        h = jnp.maximum(h, 0.0)
    w4, b4 = params_f32[3]
    ref_bf16 = jnp.sum(h * w4.reshape(1, -1), axis=-1, keepdims=True) + b4
    assert jnp.allclose(out, ref_bf16, atol=1e-3, rtol=1e-3)

    # Reference 2: pure f32 math of the original PyTorch forward -> loose
    # tolerance (bf16 weight quantization error only).
    hf = x
    for i, (w, b) in enumerate(params_f32):
        hf = hf @ w + b
        if i < 3:
            hf = jnp.maximum(hf, 0.0)
    assert jnp.allclose(out, hf, atol=5e-2, rtol=5e-2)

    print("KERNEL_OK")
</pallas_src>

<mosaic_0001>
module attributes {stable_mosaic.version = 11 : i64} {
  func.func @mlp_kernel(%arg0: i32, %arg1: memref<8x600xf32, #tpu.memory_space<vmem>>, %arg2: memref<600x256xbf16, #tpu.memory_space<vmem>>, %arg3: memref<256x128xbf16, #tpu.memory_space<vmem>>, %arg4: memref<128x64xbf16, #tpu.memory_space<vmem>>, %arg5: memref<1x768xf32, #tpu.memory_space<vmem>>, %arg6: memref<8x1xf32, #tpu.memory_space<vmem>>) attributes {dimension_semantics = [#tpu.dimension_semantics<parallel>], iteration_bounds = array<i64: 1>, scalar_prefetch = 0 : i64, scratch_operands = 0 : i64, tpu.core_type = #tpu.core_type<tc>, window_params = [{transform_indices = @transform_0, window_bounds = array<i64: 8, 600>}, {pipeline_mode = #tpu.pipeline_mode<synchronous>, transform_indices = @transform_1, window_bounds = array<i64: 600, 256>}, {pipeline_mode = #tpu.pipeline_mode<synchronous>, transform_indices = @transform_2, window_bounds = array<i64: 256, 128>}, {pipeline_mode = #tpu.pipeline_mode<synchronous>, transform_indices = @transform_3, window_bounds = array<i64: 128, 64>}, {pipeline_mode = #tpu.pipeline_mode<synchronous>, transform_indices = @transform_4, window_bounds = array<i64: 1, 768>}, {transform_indices = @transform_5, window_bounds = array<i64: 8, 1>}]} {
    %c0 = arith.constant 0 : index
    %c0_0 = arith.constant 0 : index
    %0 = vector.load %arg5[%c0, %c0_0] : memref<1x768xf32, #tpu.memory_space<vmem>>, vector<1x256xf32>
    %c0_1 = arith.constant 0 : index
    %c256 = arith.constant 256 : index
    %1 = vector.load %arg5[%c0_1, %c256] : memref<1x768xf32, #tpu.memory_space<vmem>>, vector<1x128xf32>
    %c0_2 = arith.constant 0 : index
    %c384 = arith.constant 384 : index
    %2 = vector.load %arg5[%c0_2, %c384] : memref<1x768xf32, #tpu.memory_space<vmem>>, vector<1x64xf32>
    %c0_3 = arith.constant 0 : index
    %c512 = arith.constant 512 : index
    %3 = vector.load %arg5[%c0_3, %c512] : memref<1x768xf32, #tpu.memory_space<vmem>>, vector<1x64xf32>
    %c0_4 = arith.constant 0 : index
    %c640 = arith.constant 640 : index
    %4 = vector.load %arg5[%c0_4, %c640] : memref<1x768xf32, #tpu.memory_space<vmem>>, vector<1x1xf32>
    %c0_5 = arith.constant 0 : index
    %c0_6 = arith.constant 0 : index
    %5 = vector.load %arg1[%c0_5, %c0_6] : memref<8x600xf32, #tpu.memory_space<vmem>>, vector<8x600xf32>
    %6 = arith.truncf %5 : vector<8x600xf32> to vector<8x600xbf16>
    %c0_7 = arith.constant 0 : index
    %c0_8 = arith.constant 0 : index
    %7 = vector.load %arg2[%c0_7, %c0_8] : memref<600x256xbf16, #tpu.memory_space<vmem>>, vector<600x256xbf16>
    %cst = arith.constant dense<0.000000e+00> : vector<8x256xf32>
    %8 = tpu.matmul %6, %7, %cst {dimension_numbers = #tpu.dot_dimension_numbers<[1], [0], [0], [1], [0, 0, 1, 1], [], []>} : vector<8x600xbf16>, vector<600x256xbf16>, vector<8x256xf32> -> vector<8x256xf32>
    %9 = vector.broadcast %0 : vector<1x256xf32> to vector<8x256xf32>
    %10 = arith.addf %8, %9 : vector<8x256xf32>
    %cst_9 = arith.constant 0.000000e+00 : f32
    %11 = vector.broadcast %cst_9 : f32 to vector<8x256xf32>
    %12 = arith.maximumf %10, %11 : vector<8x256xf32>
    %13 = arith.truncf %12 : vector<8x256xf32> to vector<8x256xbf16>
    %c0_10 = arith.constant 0 : index
    %c0_11 = arith.constant 0 : index
    %14 = vector.load %arg3[%c0_10, %c0_11] : memref<256x128xbf16, #tpu.memory_space<vmem>>, vector<256x128xbf16>
    %cst_12 = arith.constant dense<0.000000e+00> : vector<8x128xf32>
    %15 = tpu.matmul %13, %14, %cst_12 {dimension_numbers = #tpu.dot_dimension_numbers<[1], [0], [0], [1], [0, 0, 1, 1], [], []>} : vector<8x256xbf16>, vector<256x128xbf16>, vector<8x128xf32> -> vector<8x128xf32>
    %16 = vector.broadcast %1 : vector<1x128xf32> to vector<8x128xf32>
    %17 = arith.addf %15, %16 : vector<8x128xf32>
    %cst_13 = arith.constant 0.000000e+00 : f32
    %18 = vector.broadcast %cst_13 : f32 to vector<8x128xf32>
    %19 = arith.maximumf %17, %18 : vector<8x128xf32>
    %20 = arith.truncf %19 : vector<8x128xf32> to vector<8x128xbf16>
    %c0_14 = arith.constant 0 : index
    %c0_15 = arith.constant 0 : index
    %21 = vector.load %arg4[%c0_14, %c0_15] : memref<128x64xbf16, #tpu.memory_space<vmem>>, vector<128x64xbf16>
    %cst_16 = arith.constant dense<0.000000e+00> : vector<8x64xf32>
    %22 = tpu.matmul %20, %21, %cst_16 {dimension_numbers = #tpu.dot_dimension_numbers<[1], [0], [0], [1], [0, 0, 1, 1], [], []>} : vector<8x128xbf16>, vector<128x64xbf16>, vector<8x64xf32> -> vector<8x64xf32>
    %23 = vector.broadcast %2 : vector<1x64xf32> to vector<8x64xf32>
    %24 = arith.addf %22, %23 : vector<8x64xf32>
    %cst_17 = arith.constant 0.000000e+00 : f32
    %25 = vector.broadcast %cst_17 : f32 to vector<8x64xf32>
    %26 = arith.maximumf %24, %25 : vector<8x64xf32>
    %27 = vector.broadcast %3 : vector<1x64xf32> to vector<8x64xf32>
    %28 = arith.mulf %26, %27 : vector<8x64xf32>
    %cst_18 = arith.constant dense<0.000000e+00> : vector<8xf32>
    %29 = vector.multi_reduction <add>, %28, %cst_18 [1] : vector<8x64xf32> to vector<8xf32>
    %30 = vector.shape_cast %29 : vector<8xf32> to vector<8x1xf32>
    %31 = vector.broadcast %4 : vector<1x1xf32> to vector<8x1xf32>
    %32 = arith.addf %30, %31 : vector<8x1xf32>
    %c0_19 = arith.constant 0 : index
    %c0_20 = arith.constant 0 : index
    %33 = vector.load %arg6[%c0_19, %c0_20] : memref<8x1xf32, #tpu.memory_space<vmem>>, vector<8x1xf32>
    tpu.vector_store %arg6[%c0_19, %c0_20], %32 {strides = array<i32>} : memref<8x1xf32, #tpu.memory_space<vmem>>, vector<8x1xf32>,
    return
  }
  func.func @transform_0(%arg0: i32) -> (i32, i32) {
    %c0_i32 = arith.constant 0 : i32
    %c0_i32_0 = arith.constant 0 : i32
    return %arg0, %c0_i32 : i32, i32
  }
  func.func @transform_1(%arg0: i32) -> (i32, i32) {
    %c0_i32 = arith.constant 0 : i32
    %c0_i32_0 = arith.constant 0 : i32
    %c0_i32_1 = arith.constant 0 : i32
    return %c0_i32, %c0_i32_0 : i32, i32
  }
  func.func @transform_2(%arg0: i32) -> (i32, i32) {
    %c0_i32 = arith.constant 0 : i32
    %c0_i32_0 = arith.constant 0 : i32
    %c0_i32_1 = arith.constant 0 : i32
    return %c0_i32, %c0_i32_0 : i32, i32
  }
  func.func @transform_3(%arg0: i32) -> (i32, i32) {
    %c0_i32 = arith.constant 0 : i32
    %c0_i32_0 = arith.constant 0 : i32
    %c0_i32_1 = arith.constant 0 : i32
    return %c0_i32, %c0_i32_0 : i32, i32
  }
  func.func @transform_4(%arg0: i32) -> (i32, i32) {
    %c0_i32 = arith.constant 0 : i32
    %c0_i32_0 = arith.constant 0 : i32
    %c0_i32_1 = arith.constant 0 : i32
    return %c0_i32, %c0_i32_0 : i32, i32
  }
  func.func @transform_5(%arg0: i32) -> (i32, i32) {
    %c0_i32 = arith.constant 0 : i32
    %c0_i32_0 = arith.constant 0 : i32
    return %arg0, %c0_i32 : i32, i32
  }
}

</mosaic_0001>

<bundles_post_ra>
// kernel: tpu_custom_call.1
= control target key start
LH: loop header
LB: loop body
LE: loop exit
PB: predicated region body
PF: predicated region fallthrough
CT: control target
= control target key end

     0   :  { %10 = vsyncpa [#allocation3], 0  ;;  %s1427_s0 = inlined_call_operand.vmem [shape: f32[8,600], index: 0, kind: input, shape index: {}]   ;;  %s1428_s1 = inlined_call_operand.hbm [shape: bf16[600,256], index: 1, kind: input, shape index: {}]   ;;  %s1429_s2 = inlined_call_operand.hbm [shape: bf16[256,128], index: 2, kind: input, shape index: {}]   ;;  %s1430_s3 = inlined_call_operand.vmem [shape: bf16[128,64], index: 3, kind: input, shape index: {}]   ;;  %s1431_s4 = inlined_call_operand.vmem [shape: f32[1,768], index: 4, kind: input, shape index: {}]   ;;  %s1432_s5 = inlined_call_operand.vmem [shape: f32[8,1], index: 5, kind: output, shape index: {}]  }
   0x1   :  { %11 = vsyncpa [#allocation5], 0  ;;  %s1323_s18 = smov [#allocation2]  }
   0x2   :  { %s19_s19 = sshll.u32 %s1323_s18, 4  ;;  %s20_s19 = int_to_ptr.vmem [resolvable:$true] %s19_s19 }
   0x3   :  { %s1287_s20 = scalar_lea.vmem %s20_s19, 9600  ;;  %p1292_p1 = scmp.lt.s32.totalorder %s20_s19, %s20_s19 }
   0x4   :  { %p1288_p0 = scmp.ne.s32.totalorder %s20_s19, %s1287_s20  ;;  %p1293_p2 = scmp.lt.s32.totalorder %s1287_s20, %s1287_s20 }
   0x6   :  { %p1294_p3 = por %p1293_p2, %p1292_p1 }
   0x8   :  { %p1295_p4 = pnand %p1294_p3, %p1288_p0 }
   0xa   :  { %1298 = shalt.err (!%p1295_p4)
}
   0xb   :  { %s1324_s21 = smov 128   ;;  %s1325_s22 = smov 8  }
   0xc   :  { %25 = dma.hbm_to_vmem [thread:$0]  %s1428_s1, 9600, %s20_s19, [#allocation3], %s1324_s21, %s1324_s21, %s1325_s22  }
   0xd   :  { %s1326_s25 = smov [#allocation4]  }
   0xe   :  { %s31_s26 = sshll.u32 %s1326_s25, 4  ;;  %s32_s26 = int_to_ptr.vmem [resolvable:$true] %s31_s26 }
   0xf   :  { %s1307_s27 = scalar_lea.vmem %s32_s26, 2048  ;;  %p1312_p6 = scmp.lt.s32.totalorder %s32_s26, %s32_s26 }
  0x10   :  { %p1308_p5 = scmp.ne.s32.totalorder %s32_s26, %s1307_s27  ;;  %p1313_p7 = scmp.lt.s32.totalorder %s1307_s27, %s1307_s27 }
  0x12   :  { %p1314_p8 = por %p1313_p7, %p1312_p6 }
  0x14   :  { %p1315_p9 = pnand %p1314_p8, %p1308_p5 }
  0x16   :  { %1318 = shalt.err (!%p1315_p9)
}
  0x17   :  { %s1327_s28 = smov 64   ;;  %s1328_s29 = smov 4  }
  0x18   :  { %37 = dma.hbm_to_vmem [thread:$0]  %s1429_s2, 2048, %s32_s26, [#allocation5], %s1327_s28, %s1327_s28, %s1328_s29  }
  0x19   :  { %1319 = dma.done.wait [#allocation3], 9600  }
  0x1a   :  { %1320 = vsyncadd [#allocation3], 4294957696 }
  0x1b   :  { %1321 = dma.done.wait [#allocation5], 2048  }
  0x1c   :  { %1322 = vsyncadd [#allocation5], 4294965248  ;;  %v1142_v0 = vld [vmem:[#allocation2 + $0x74] ss:$8 sps:$4 sm:$0xff]   ;;  %v1144_v1 = vld [vmem:[#allocation2 + $0x70] ss:$8 sps:$4 sm:$0xff]  }
  0x1d   :  { %536 = vmatprep.subr.bf16.mxu0 %v1142_v0  ;;  %v1145_v2 = vld [vmem:[#allocation2 + $0x174] ss:$8 sps:$4 sm:$0xff]   ;;  %v1147_v3 = vld [vmem:[#allocation2 + $0x170] ss:$8 sps:$4 sm:$0xff]   ;;  %v1148_v4 = vld [vmem:[#allocation2 + $0x64] ss:$8 sps:$4 sm:$0xff]  }
  0x1e   :  { %537 = vmatpush1.bf16.msra.mxu0 %v1144_v1  ;;  %v1150_v5 = vld [vmem:[#allocation2 + $0x60] ss:$8 sps:$4 sm:$0xff]   ;;  %577 = vmatprep.subr.bf16.mxu1 %v1145_v2  ;;  %v1151_v6 = vld [vmem:[#allocation2 + $0x164] ss:$8 sps:$4 sm:$0xff]   ;;  %v1154_v8 = vld [vmem:[#allocation2 + $0x54] ss:$8 sps:$4 sm:$0xff]  }
  0x1f   :  { %578 = vmatpush1.bf16.msra.mxu1 %v1147_v3  ;;  %538 = vmatprep.subr.bf16.mxu0 %v1148_v4  ;;  %v1153_v7 = vld [vmem:[#allocation2 + $0x160] ss:$8 sps:$4 sm:$0xff]   ;;  %v1156_v9 = vld [vmem:[#allocation2 + $0x50] ss:$8 sps:$4 sm:$0xff]   ;;  %v1157_v10 = vld [vmem:[#allocation2 + $0x154] ss:$8 sps:$4 sm:$0xff]  }
  0x20   :  { %579 = vmatprep.subr.bf16.mxu1 %v1151_v6  ;;  %v1160_v11 = vld [vmem:[#allocation2 + $0x44] ss:$8 sps:$4 sm:$0xff]   ;;  %v1159_v12 = vld [vmem:[#allocation2 + $0x150] ss:$8 sps:$4 sm:$0xff]   ;;  %v1162_v14 = vld [vmem:[#allocation2 + $0x40] ss:$8 sps:$4 sm:$0xff]  }
  0x21   :  { %v1163_v13 = vld [vmem:[#allocation2 + $0x144] ss:$8 sps:$4 sm:$0xff]   ;;  %v1166_v15 = vld [vmem:[#allocation2 + $0x34] ss:$8 sps:$4 sm:$0xff]   ;;  %v1165_v16 = vld [vmem:[#allocation2 + $0x140] ss:$8 sps:$4 sm:$0xff]  }
  0x22   :  { %539 = vmatpush1.bf16.msra.mxu0 %v1150_v5  ;;  %v1169_v17 = vld [vmem:[#allocation2 + $0x134] ss:$8 sps:$4 sm:$0xff]   ;;  %v1168_v18 = vld [vmem:[#allocation2 + $0x30] ss:$8 sps:$4 sm:$0xff]   ;;  %v1172_v19 = vld [vmem:[#allocation2 + $0x24] ss:$8 sps:$4 sm:$0xff]  }
  0x23   :  { %540 = vmatprep.subr.bf16.mxu0 %v1154_v8  ;;  %580 = vmatpush1.bf16.msra.mxu1 %v1153_v7  ;;  %v1171_v20 = vld [vmem:[#allocation2 + $0x130] ss:$8 sps:$4 sm:$0xff]   ;;  %v1175_v21 = vld [vmem:[#allocation2 + $0x124] ss:$8 sps:$4 sm:$0xff]   ;;  %v1174_v22 = vld [vmem:[#allocation2 + $0x20] ss:$8 sps:$4 sm:$0xff]  }
  0x24   :  { %581 = vmatprep.subr.bf16.mxu1 %v1157_v10  ;;  %v1178_v23 = vld [vmem:[#allocation2 + $0x14] ss:$8 sps:$4 sm:$0xff]   ;;  %v1177_v24 = vld [vmem:[#allocation2 + $0x120] ss:$8 sps:$4 sm:$0xff]   ;;  %v1180_v26 = vld [vmem:[#allocation2 + $0x10] ss:$8 sps:$4 sm:$0xff]  }
  0x25   :  { %v1181_v25 = vld [vmem:[#allocation2 + $0x114] ss:$8 sps:$4 sm:$0xff]   ;;  %v1184_v27 = vld [vmem:[#allocation2 + $0x4] ss:$8 sps:$4 sm:$0xff]   ;;  %v1183_v28 = vld [vmem:[#allocation2 + $0x110] ss:$8 sps:$4 sm:$0xff]  }
  0x26   :  { %541 = vmatpush1.bf16.msra.mxu0 %v1156_v9  ;;  %v1187_v29 = vld [vmem:[#allocation2 + $0x104] ss:$8 sps:$4 sm:$0xff]   ;;  %v1186_v30 = vld [vmem:[#allocation2] ss:$8 sps:$4 sm:$0xff]   ;;  %v1190_v31 = vld [vmem:[#allocation2 + $0xf4] ss:$8 sps:$4 sm:$0xff]  }
  0x27   :  { %542 = vmatprep.subr.bf16.mxu0 %v1160_v11  ;;  %582 = vmatpush1.bf16.msra.mxu1 %v1159_v12  ;;  %v1189_v32 = vld [vmem:[#allocation2 + $0x100] ss:$8 sps:$4 sm:$0xff]   ;;  %v1193_v33 = vld [vmem:[#allocation2 + $0x1f4] ss:$8 sps:$4 sm:$0xff]   ;;  %v1192_v34 = vld [vmem:[#allocation2 + $0xf0] ss:$8 sps:$4 sm:$0xff]  }
  0x28   :  { %583 = vmatprep.subr.bf16.mxu1 %v1163_v13  ;;  %v1196_v35 = vld [vmem:[#allocation2 + $0xe4] ss:$8 sps:$4 sm:$0xff]   ;;  %v1195_v36 = vld [vmem:[#allocation2 + $0x1f0] ss:$8 sps:$4 sm:$0xff]   ;;  %v1198_v38 = vld [vmem:[#allocation2 + $0xe0] ss:$8 sps:$4 sm:$0xff]  }
  0x29   :  { %v1199_v37 = vld [vmem:[#allocation2 + $0x1e4] ss:$8 sps:$4 sm:$0xff]   ;;  %v1202_v39 = vld [vmem:[#allocation2 + $0xd4] ss:$8 sps:$4 sm:$0xff]   ;;  %v1201_v40 = vld [vmem:[#allocation2 + $0x1e0] ss:$8 sps:$4 sm:$0xff]  }
  0x2a   :  { %543 = vmatpush1.bf16.msra.mxu0 %v1162_v14  ;;  %v1205_v41 = vld [vmem:[#allocation2 + $0x1d4] ss:$8 sps:$4 sm:$0xff]   ;;  %v1204_v42 = vld [vmem:[#allocation2 + $0xd0] ss:$8 sps:$4 sm:$0xff]   ;;  %v1208_v43 = vld [vmem:[#allocation2 + $0xc4] ss:$8 sps:$4 sm:$0xff]  }
  0x2b   :  { %544 = vmatprep.subr.bf16.mxu0 %v1166_v15  ;;  %584 = vmatpush1.bf16.msra.mxu1 %v1165_v16  ;;  %v1207_v44 = vld [vmem:[#allocation2 + $0x1d0] ss:$8 sps:$4 sm:$0xff]   ;;  %v1211_v45 = vld [vmem:[#allocation2 + $0x1c4] ss:$8 sps:$4 sm:$0xff]   ;;  %v1210_v47 = vld [vmem:[#allocation2 + $0xc0] ss:$8 sps:$4 sm:$0xff]  }
  0x2c   :  { %585 = vmatprep.subr.bf16.mxu1 %v1169_v17  ;;  %v55_v46 = vld [vmem:[%s1427_s0 + $0x8] sm:$0xff]  ;;  %v1214_v48 = vld [vmem:[#allocation2 + $0xb4] ss:$8 sps:$4 sm:$0xff]   ;;  %v1216_v55 = vld [vmem:[#allocation2 + $0xb0] ss:$8 sps:$4 sm:$0xff]   ;;  %vm529_vm0 = vcmask 1043456  }
  0x2d   :  { %v60_v49 = vpack.c.bf16 %v55_v46, %v55_v46  ;;  %v57_v50 = vld [vmem:[%s1427_s0 + $0x18] sm:$0xff]  ;;  %v138_v51 = vld [vmem:[#allocation2 + $0x250] sm:$0xff]  ;;  %v1213_v53 = vld [vmem:[#allocation2 + $0x1c0] ss:$8 sps:$4 sm:$0xff]   ;;  %v1329_v14 = vmov 0   ;;  %vm525_vm1 = vcmask 719872  }
  0x2e   :  { %545 = vmatpush1.bf16.msra.mxu0 %v1168_v18  ;;  %v62_v52 = vpack.c.bf16 %v57_v50, %v57_v50  ;;  %v1217_v54 = vld [vmem:[#allocation2 + $0x1b4] ss:$8 sps:$4 sm:$0xff]   ;;  %v1050_v56 = vcombine.low %v138_v51, %v138_v51  ;;  %v1220_v57 = vld [vmem:[#allocation2 + $0xa4] ss:$8 sps:$4 sm:$0xff]   ;;  %v1219_v58 = vld [vmem:[#allocation2 + $0x1b0] ss:$8 sps:$4 sm:$0xff]   ;;  %v1051_v9 = vcombine.high %v138_v51, %v138_v51  ;;  %v140_v50 = vlaneseq }
  0x2f   :  { %546 = vmatprep.subr.bf16.mxu0 %v1172_v19  ;;  %586 = vmatpush1.bf16.msra.mxu1 %v1171_v20  ;;  %v1222_v59 = vld [vmem:[#allocation2 + $0xa0] ss:$8 sps:$4 sm:$0xff]   ;;  %v1223_v60 = vld [vmem:[#allocation2 + $0x1a4] ss:$8 sps:$4 sm:$0xff]   ;;  %v1226_v62 = vld [vmem:[#allocation2 + $0x94] ss:$8 sps:$4 sm:$0xff]  }
  0x30   :  { %587 = vmatprep.subr.bf16.mxu1 %v1175_v21  ;;  %568 = vmatprep.mubr.bf16.mxu0 %v60_v49  ;;  %v1225_v61 = vld [vmem:[#allocation2 + $0x1a0] ss:$8 sps:$4 sm:$0xff]   ;;  %v531_v63 = vsel %vm529_vm0, %v1050_v56, 0  ;;  %v1229_v0 = vld [vmem:[#allocation2 + $0x194] ss:$8 sps:$4 sm:$0xff]   ;;  %vm1331_vm2 = vmmov 0  }
  0x31   :  { %609 = vmatprep.mubr.bf16.mxu1 %v62_v52  ;;  %v1228_v1 = vld [vmem:[#allocation2 + $0x90] ss:$8 sps:$4 sm:$0xff]   ;;  %v1232_v2 = vld [vmem:[#allocation2 + $0x84] ss:$8 sps:$4 sm:$0xff]   ;;  %v1234_v5 = vld [vmem:[#allocation2 + $0x80] ss:$8 sps:$4 sm:$0xff]  }
  0x32   :  { %547 = vmatpush1.bf16.msra.mxu0 %v1174_v22  ;;  %v1231_v3 = vld [vmem:[#allocation2 + $0x190] ss:$8 sps:$4 sm:$0xff]   ;;  %v1235_v4 = vld [vmem:[#allocation2 + $0x184] ss:$8 sps:$4 sm:$0xff]   ;;  %v1237_v7 = vld [vmem:[#allocation2 + $0x180] ss:$8 sps:$4 sm:$0xff]  }
  0x33   :  { %548 = vmatprep.subr.bf16.mxu0 %v1178_v23  ;;  %588 = vmatpush1.bf16.msra.mxu1 %v1177_v24  ;;  %v54_v6 = vld [vmem:[%s1427_s0] sm:$0xff]  ;;  %v56_v8 = vld [vmem:[%s1427_s0 + $0x10] sm:$0xff]  ;;  %v1275_v46 = vld [vmem:[%s1430_s3 + $0x18] sm:$0xff]   ;;  %vm957_vm3 = vcmask 523264   ;;  %vm968_vm4 = vcmask 7168  }
  0x34   :  { %589 = vmatprep.subr.bf16.mxu1 %v1181_v25  ;;  %v59_v10 = vpack.c.bf16 %v54_v6, %v54_v6  ;;  %v1242_v11 = vld [vmem:[#allocation2 + $0x244] ss:$8 sps:$4 sm:$0xff]   ;;  %v61_v12 = vpack.c.bf16 %v56_v8, %v56_v8  ;;  %v1240_v13 = vld [vmem:[#allocation2 + $0x240] ss:$8 sps:$4 sm:$0xff]   ;;  %v1245_v15 = vld [vmem:[#allocation2 + $0x234] ss:$8 sps:$4 sm:$0xff]  }
  0x35   :  { %v1243_v16 = vld [vmem:[#allocation2 + $0x230] ss:$8 sps:$4 sm:$0xff]   ;;  %v1248_v17 = vld [vmem:[#allocation2 + $0x224] ss:$8 sps:$4 sm:$0xff]   ;;  %v1246_v18 = vld [vmem:[#allocation2 + $0x220] ss:$8 sps:$4 sm:$0xff]  }
  0x36   :  { %549 = vmatpush1.bf16.msra.mxu0 %v1180_v26  ;;  %v1251_v19 = vld [vmem:[#allocation2 + $0x214] ss:$8 sps:$4 sm:$0xff]   ;;  %v1249_v20 = vld [vmem:[#allocation2 + $0x210] ss:$8 sps:$4 sm:$0xff]   ;;  %v1254_v21 = vld [vmem:[#allocation2 + $0x204] ss:$8 sps:$4 sm:$0xff]  }
  0x37   :  { %550 = vmatprep.subr.bf16.mxu0 %v1184_v27  ;;  %590 = vmatpush1.bf16.msra.mxu1 %v1183_v28  ;;  %v1252_v22 = vld [vmem:[#allocation2 + $0x200] ss:$8 sps:$4 sm:$0xff]   ;;  %v1255_v25 = vld [vmem:[#allocation4 + $0x78] sm:$0xff]  }
  0x38   :  { %591 = vmatprep.subr.bf16.mxu1 %v1187_v29  ;;  %v58_v23 = vld [vmem:[%s1427_s0 + $0x20] sm:$0xff]  ;;  %v1256_v26 = vld [vmem:[#allocation4 + $0x38] sm:$0xff]   ;;  %v1257_v27 = vld [vmem:[#allocation4 + $0x70] sm:$0xff]  }
  0x39   :  { %v63_v24 = vpack.c.bf16 %v58_v23, %v58_v23  ;;  %v1258_v28 = vld [vmem:[#allocation4 + $0x30] sm:$0xff]   ;;  %v1259_v29 = vld [vmem:[#allocation4 + $0x68] sm:$0xff]  }
  0x3a   :  { %551 = vmatpush1.bf16.msra.mxu0 %v1186_v30  ;;  %v1260_v30 = vld [vmem:[#allocation4 + $0x28] sm:$0xff]  }
  0x3b   :  { %552 = vmatprep.subr.bf16.mxu0 %v1190_v31  ;;  %592 = vmatpush1.bf16.msra.mxu1 %v1189_v32  ;;  %v1261_v31 = vld [vmem:[#allocation4 + $0x60] sm:$0xff]  }
  0x3c   :  { %593 = vmatprep.subr.bf16.mxu1 %v1193_v33  ;;  %v1262_v32 = vld [vmem:[#allocation4 + $0x20] sm:$0xff]   ;;  %v1263_v33 = vld [vmem:[#allocation4 + $0x58] sm:$0xff]  }
  0x3e   :  { %553 = vmatpush2.bf16.msra.mxu0 %v1192_v34  ;;  %v1264_v34 = vld [vmem:[#allocation4 + $0x18] sm:$0xff]  }
  0x3f   :  { %554 = vmatprep.subr.bf16.mxu0 %v1196_v35  ;;  %594 = vmatpush2.bf16.msra.mxu1 %v1195_v36  ;;  %v1265_v35 = vld [vmem:[#allocation4 + $0x50] sm:$0xff]  }
  0x40   :  { %595 = vmatprep.subr.bf16.mxu1 %v1199_v37  ;;  %v1266_v36 = vld [vmem:[#allocation4 + $0x10] sm:$0xff]   ;;  %v1267_v37 = vld [vmem:[#allocation4 + $0x48] sm:$0xff]  }
  0x42   :  { %555 = vmatpush2.bf16.msra.mxu0 %v1198_v38  ;;  %v1268_v38 = vld [vmem:[#allocation4 + $0x8] sm:$0xff]  }
  0x43   :  { %556 = vmatprep.subr.bf16.mxu0 %v1202_v39  ;;  %596 = vmatpush2.bf16.msra.mxu1 %v1201_v40  ;;  %v1269_v39 = vld [vmem:[#allocation4 + $0x40] sm:$0xff]  }
  0x44   :  { %597 = vmatprep.subr.bf16.mxu1 %v1205_v41  ;;  %v1270_v40 = vld [vmem:[#allocation4] sm:$0xff]  }
  0x45   :  { %v1271_v41 = vld [vmem:[%s1430_s3 + $0x38] sm:$0xff]  }
  0x46   :  { %557 = vmatpush2.bf16.msra.mxu0 %v1204_v42  ;;  %v1330_v42 = vmov 0.0  }
  0x47   :  { %558 = vmatprep.subr.bf16.mxu0 %v1208_v43  ;;  %598 = vmatpush2.bf16.msra.mxu1 %v1207_v44  ;;  %v1272_v43 = vld [vmem:[%s1430_s3 + $0x30] sm:$0xff]   ;;  %v1273_v44 = vld [vmem:[%s1430_s3 + $0x28] sm:$0xff]  }
  0x48   :  { %599 = vmatprep.subr.bf16.mxu1 %v1211_v45  ;;  %v1274_v45 = vld [vmem:[%s1430_s3 + $0x20] sm:$0xff]  }
  0x4a   :  { %559 = vmatpush2.bf16.msra.mxu0 %v1210_v47 }
  0x4b   :  { %560 = vmatprep.subr.bf16.mxu0 %v1214_v48  ;;  %600 = vmatpush2.bf16.msra.mxu1 %v1213_v53 }
  0x4c   :  { %601 = vmatprep.subr.bf16.mxu1 %v1217_v54 }
  0x4e   :  { %561 = vmatpush2.bf16.msra.mxu0 %v1216_v55  ;;  %v141_v55 = vshrl.u32 %v140_v50, 7 }
  0x4f   :  { %562 = vmatprep.subr.bf16.mxu0 %v1220_v57  ;;  %602 = vmatpush2.bf16.msra.mxu1 %v1219_v58  ;;  %v49_v58 = vld [vmem:[%s1431_s4] sm:$0x3] }
  0x50   :  { %603 = vmatprep.subr.bf16.mxu1 %v1223_v60  ;;  %v142_v57 = vsub.s32 0, %v141_v55 }
  0x52   :  { %563 = vmatpush2.bf16.msra.mxu0 %v1222_v59  ;;  %v146_v59 = vsub.s32 1, %v141_v55  ;;  %v143_v60 = vrot.slane %v49_v58, %v142_v57 }
  0x53   :  { %564 = vmatprep.subr.bf16.mxu0 %v1226_v62  ;;  %604 = vmatpush2.bf16.msra.mxu1 %v1225_v61 }
  0x54   :  { %605 = vmatprep.subr.bf16.mxu1 %v1229_v0  ;;  %v147_v61 = vrot.slane %v49_v58, %v146_v59 }
  0x56   :  { %565 = vmatpush2.bf16.msra.mxu0 %v1228_v1 }
  0x57   :  { %566 = vmatprep.subr.bf16.mxu0 %v1232_v2  ;;  %606 = vmatpush2.bf16.msra.mxu1 %v1231_v3 }
  0x58   :  { %607 = vmatprep.subr.bf16.mxu1 %v1235_v4 }
  0x5a   :  { %567 = vmatpush2.bf16.msra.mxu0 %v1234_v5 }
  0x5b   :  { %1052 = vmatprep.subr.msk.bf16.mxu0 %vm529_vm0, %v1051_v9  ;;  %608 = vmatpush2.bf16.msra.mxu1 %v1237_v7 }
  0x5c   :  { %1082 = vmatprep.subr.bf16.mxu1 %v1255_v25 }
  0x5d   :  { %569 = vmatmul.mubr.bf16.vlgmr.msra.gmra.mxu0 %v59_v10 }
  0x5e   :  { %623 = vmatpush1.bf16.msra.mxu0 %v531_v63  ;;  %650 = vmatprep.mubr.bf16.mxu0 %v1329_v14  ;;  %v1278_v14 = vld [vmem:[%s1430_s3] sm:$0xff]  }
  0x5f   :  { %610 = vmatmul.mubr.bf16.vlgmr.msra.gmra.mxu1 %v61_v12  ;;  %624 = vmatprep.subr.bf16.mxu0 %v1242_v11  ;;  %v1276_v12 = vld [vmem:[%s1430_s3 + $0x10] sm:$0xff]  }
  0x60   :  { %1083 = vmatpush3.bf16.msra.mxu1 %v1256_v26 }
  0x61   :  { %1084 = vmatprep.subr.bf16.mxu1 %v1257_v27 }
  0x62   :  { %625 = vmatpush1.bf16.msra.mxu0 %v1240_v13  ;;  %v1277_v13 = vld [vmem:[%s1430_s3 + $0x8] sm:$0xff]  }
  0x63   :  { %626 = vmatprep.subr.bf16.mxu0 %v1245_v15 }
  0x64   :  { %1085 = vmatpush3.bf16.msra.mxu1 %v1258_v28  ;;  %v1080_v28 = vld [vmem:[%s1431_s4 + $0x4] ss:$0 sm:$0xff] }
  0x65   :  { %1086 = vmatprep.subr.bf16.mxu1 %v1259_v29 }
  0x66   :  { %627 = vmatpush1.bf16.msra.mxu0 %v1243_v16  ;;  %v1054_v16 = vld [vmem:[%s1431_s4 + $0x2] ss:$0 sm:$0xff] }
  0x67   :  { %628 = vmatprep.subr.bf16.mxu0 %v1248_v17 }
  0x68   :  { %1087 = vmatpush3.bf16.msra.mxu1 %v1260_v30 }
  0x69   :  { %1088 = vmatprep.subr.bf16.mxu1 %v1261_v31 }
  0x6a   :  { %629 = vmatpush1.bf16.msra.mxu0 %v1246_v18 }
  0x6b   :  { %630 = vmatprep.subr.bf16.mxu0 %v1251_v19 }
  0x6c   :  { %1089 = vmatpush3.bf16.msra.mxu1 %v1262_v32 }
  0x6d   :  { %1090 = vmatprep.subr.bf16.mxu1 %v1263_v33 }
  0x6e   :  { %631 = vmatpush1.bf16.msra.mxu0 %v1249_v20 }
  0x6f   :  { %632 = vmatprep.subr.bf16.mxu0 %v1254_v21 }
  0x70   :  { %1091 = vmatpush3.bf16.msra.mxu1 %v1264_v34  ;;  %v1081_v34 = vld [vmem:[%s1431_s4 + $0x5] ss:$0 sm:$0xff] }
  0x71   :  { %1092 = vmatprep.subr.bf16.mxu1 %v1265_v35 }
  0x72   :  { %633 = vmatpush1.bf16.msra.mxu0 %v1252_v22 }
  0x73   :  { %1113 = vmatprep.subr.bf16.mxu0 %v1330_v42 }
  0x74   :  { %1093 = vmatpush3.bf16.msra.mxu1 %v1266_v36 }
  0x75   :  { %1053 = vmatmul.mubr.msk.bf16.vlgmr.msra.gmra.mxu0 %vm525_vm1, %v63_v24  ;;  %1094 = vmatprep.subr.bf16.mxu1 %v1267_v37  ;;  %v1071_v24 = vld [vmem:[%s1431_s4 + $0x3] ss:$0 sm:$0xff] }
  0x76   :  { %1114 = vmatpush3.bf16.msra.mxu0 %v1271_v41  ;;  %1129 = vmatprep.mubr.msk.bf16.mxu0 %vm1331_vm2, %v1330_v42 }
  0x77   :  { %1115 = vmatprep.subr.bf16.mxu0 %v1330_v42 }
  0x78   :  { %1095 = vmatpush3.bf16.msra.mxu1 %v1268_v38 }
  0x79   :  { %1096 = vmatprep.subr.bf16.mxu1 %v1269_v39 }
  0x7a   :  { %1116 = vmatpush3.bf16.msra.mxu0 %v1272_v43 }
  0x7b   :  { %1117 = vmatprep.subr.bf16.mxu0 %v1330_v42 }
  0x7c   :  { %1097 = vmatpush3.bf16.msra.mxu1 %v1270_v40 }
  0x7e   :  { %1118 = vmatpush3.bf16.msra.mxu0 %v1273_v44 }
  0x7f   :  { %1119 = vmatprep.subr.bf16.mxu0 %v1330_v42 }
  0x82   :  { %1120 = vmatpush3.bf16.msra.mxu0 %v1274_v45 }
  0x83   :  { %1121 = vmatprep.subr.bf16.mxu0 %v1330_v42 }
  0x86   :  { %1122 = vmatpush3.bf16.msra.mxu0 %v1275_v46 }
  0x87   :  { %1123 = vmatprep.subr.bf16.mxu0 %v1330_v42 }
  0x8a   :  { %1124 = vmatpush3.bf16.msra.mxu0 %v1276_v12 }
  0x8b   :  { %1125 = vmatprep.subr.bf16.mxu0 %v1330_v42 }
  0x8e   :  { %1126 = vmatpush3.bf16.msra.mxu0 %v1277_v13 }
  0x8f   :  { %1127 = vmatprep.subr.bf16.mxu0 %v1330_v42 }
  0x92   :  { %1128 = vmatpush3.bf16.msra.mxu0 %v1278_v14 }
 0x11d   :  { %v570_v47 = vpop.f32.mrf.mxu0 }
 0x11e   :  { %v571_v62 = vadd.f32 %v570_v47, %v143_v60 }
 0x11f   :  { %v572_v48 = vpop.f32.mrf.mxu0  ;;  %v611_v49 = vpop.f32.mrf.mxu1 }
 0x120   :  { %v573_v63 = vadd.f32 %v572_v48, %v147_v61  ;;  %v612_v0 = vadd.f32 %v611_v49, %v571_v62 }
 0x121   :  { %v574_v51 = vpop.f32.mrf.mxu0  ;;  %v613_v52 = vpop.f32.mrf.mxu1 }
 0x122   :  { %v614_v2 = vadd.f32 %v613_v52, %v573_v63 }
 0x123   :  { %v575_v53 = vpop.f32.mrf.mxu0  ;;  %v615_v54 = vpop.f32.mrf.mxu1 }
 0x125   :  { %v616_v56 = vpop.f32.mrf.mxu1 }
 0x135   :  { %v652_v1 = vpop.f32.mrf.mxu0 }
 0x136   :  { %v653_v3 = vadd.f32 %v652_v1, %v612_v0 }
 0x137   :  { %v654_v4 = vpop.f32.mrf.mxu0 }
 0x138   :  { %v655_v5 = vadd.f32 %v654_v4, %v614_v2  ;;  %v659_v6 = vmax.f32 %v653_v3, 0.0 }
 0x139   :  { %v656_v7 = vpop.f32.mrf.mxu0 }
 0x13a   :  { %v660_v8 = vmax.f32 %v655_v5, 0.0  ;;  %v661_v11 = vpack.c.bf16 %v659_v6, %v659_v6 }
 0x13b   :  { %v657_v9 = vpop.f32.mrf.mxu0 }
 0x13c   :  { %v662_v10 = vpack.c.bf16 %v660_v8, %v660_v8 }
 0x13e   :  { %829 = vmatprep.mubr.bf16.mxu1 %v662_v10 }
 0x13f   :  { %830 = vmatmul.mubr.bf16.vlgmr.msra.gmra.mxu1 %v661_v11 }
 0x1ff   :  { %v1098_v15 = vpop.f32.mrf.mxu1 }
 0x201   :  { %v1099_v17 = vpop.f32.mrf.mxu1 }
 0x202   :  { %v1100_v18 = vadd.f32 %v1099_v17, %v1098_v15 }
 0x203   :  { %v1101_v19 = vpop.f32.mrf.mxu1 }
 0x204   :  { %v832_v20 = vadd.f32 %v1100_v18, %v1054_v16 }
 0x205   :  { %v1102_v21 = vpop.f32.mrf.mxu1 }
 0x206   :  { %v837_v22 = vmax.f32 %v832_v20, 0.0 }
 0x208   :  { %v838_v23 = vpack.c.bf16 %v837_v22, %v837_v22 }
 0x20a   :  { %1130 = vmatmul.mubr.bf16.vlgmr.msra.gmra.mxu0 %v838_v23 }
 0x2ca   :  { %v943_v25 = vpop.f32.mrf.mxu0 }
 0x2cb   :  { %v944_v26 = vadd.f32 %v1071_v24, %v943_v25 }
 0x2cc   :  { %v1131_v27 = vpop.f32.mrf.mxu0 }
 0x2cd   :  { %v949_v29 = vmax.f32 %v944_v26, 0.0 }
 0x2ce   :  { %v946_v30 = vpop.f32.mrf.mxu0 }
 0x2cf   :  { %v956_v31 = vmul.f32 %v1080_v28, %v949_v29 }
 0x2d0   :  { %v1132_v32 = vpop.f32.mrf.mxu0 }
 0x2d1   :  { %v958_v33 = vsel %vm957_vm3, %v956_v31, 0.0 }
 0x2d2   :  { %959 = vadd.xlane.f32.xlu0 %v958_v33 }
 0x35b   :  { %v960_v35 = vpop.xlane.xlu0 %959 }
 0x35c   :  { %v967_v36 = vadd.f32 %v1081_v34, %v960_v35 }
 0x35e   :  { %969 = vst.msk [vmem:[%s1432_s5] sm:$0xff] %vm968_vm4, %v967_v36 }
 0x35f   :  { %974 = vsyncpa [#allocation3], 1 }
 0x360   :  { %975 = vsyncpa [#allocation5], 1 }

</bundles_post_ra>
